<compile_context>
chip_gen: v7x
topology: tpu7x:2x2x1
jax: 0.10.0
libtpu: 0.0.40
codegen_flags: <defaults>
</compile_context>

<pallas_src>
import functools

import jax
import jax.numpy as jnp
from jax.experimental import pallas as pl
from jax.experimental.pallas import tpu as pltpu

LANES = 128


def _convblock_kernel(x_ref, w_ref, shift_ref, o_ref, *, K, stride, Ho, Ws, Cpad):
    """One batch element per grid step.

    x_ref:     (stride*stride, Hs*Ws, Cin)  bf16  space-to-depth planes,
                                                  spatially flattened
    w_ref:     (K*K, Cin, Cpad)             bf16  BN-scale-folded conv weights
                                                  (VMEM-resident)
    shift_ref: (1, Cpad)                    f32   folded conv-bias + BN shift
                                                  (VMEM-resident)
    o_ref:     (1, Ho*Ws, Cpad)             f32   lane-dense output slab
                                                  (Ws-Wo garbage cols included)
    """
    M = Ho * Ws
    acc = jnp.zeros((M, Cpad), jnp.float32)

    # K*K statically-unrolled taps; each is one contiguous (M, Cin) slab matmul.
    for kh in range(K):
        hb, p = divmod(kh, stride)
        for kw in range(K):
            wb, q = divmod(kw, stride)
            g = p * stride + q                      # parity plane index
            base = hb * Ws + wb                     # static slab offset
            lhs = x_ref[g, base:base + M, :]        # (M, Cin) bf16, contiguous
            acc = acc + jnp.dot(lhs, w_ref[kh * K + kw],
                                preferred_element_type=jnp.float32)

    # Epilogue: folded bias/BN shift + ReLU, full-lane store.
    y = jnp.maximum(acc + shift_ref[...], 0.0)
    o_ref[0] = y.astype(o_ref.dtype)


def conv_block(x, weight, bias, gamma, beta, running_mean, running_var,
               *, stride=2, bn_eps=1e-5):
    """ConvBlock forward: Conv2d(k, stride, pad=0) -> BN (eval) -> ReLU. NCHW in/out."""
    N, Cin, H, W = x.shape
    Cout, Cin_w, K, K2 = weight.shape
    assert Cin_w == Cin and K == K2

    Ho = (H - K) // stride + 1
    Wo = (W - K) // stride + 1
    S2 = stride * stride
    hb_max = (K - 1) // stride

    # Space-to-depth plane sizes.  +1 row on Hs so every tap's contiguous slab
    # of Ho*Ws rows stays in-bounds even when it spills into the next row.
    Hs = max(pl.cdiv(H, stride), hb_max + Ho + 1)
    Ws = max(pl.cdiv(W, stride), hb_max + Wo)

    # ---- single space-to-depth relayout of the input (only x movement) ----
    x_p = jnp.pad(x.astype(jnp.bfloat16),
                  ((0, 0), (0, 0), (0, stride * Hs - H), (0, stride * Ws - W)))
    x_s = x_p.reshape(N, Cin, Hs, stride, Ws, stride)
    x_s = x_s.transpose(0, 3, 5, 2, 4, 1)            # (N, p, q, Hs, Ws, Cin)
    x_s = x_s.reshape(N * S2, Hs * Ws, Cin)          # flattened parity planes

    # ---- fold eval-mode BN: scale into weights, shift into bias ----
    Cpad = pl.cdiv(Cout, LANES) * LANES
    scale = gamma / jnp.sqrt(running_var + bn_eps)
    shift = (bias - running_mean) * scale + beta
    w_f = weight.astype(jnp.float32) * scale[:, None, None, None]
    w_k = w_f.transpose(2, 3, 1, 0).reshape(K * K, Cin, Cout)
    w_k = jnp.pad(w_k, ((0, 0), (0, 0), (0, Cpad - Cout))).astype(jnp.bfloat16)
    shift_p = jnp.pad(shift, (0, Cpad - Cout)).reshape(1, Cpad).astype(jnp.float32)

    kernel = functools.partial(_convblock_kernel, K=K, stride=stride,
                               Ho=Ho, Ws=Ws, Cpad=Cpad)

    flops = 2 * N * (Ho * Ws) * (K * K) * Cin * Cpad
    bytes_accessed = (x_s.size * 2 + w_k.size * 2 + Cpad * 4
                      + N * (Ho * Ws) * Cpad * 4)

    out = pl.pallas_call(
        kernel,
        out_shape=jax.ShapeDtypeStruct((N, Ho * Ws, Cpad), jnp.float32),
        grid=(N,),
        in_specs=[
            # One batch element's stride*stride flattened planes per grid step.
            pl.BlockSpec((S2, Hs * Ws, Cin), lambda n: (n, 0, 0)),
            # Weights / shift: same block every step -> stay VMEM-resident.
            pl.BlockSpec((K * K, Cin, Cpad), lambda n: (0, 0, 0)),
            pl.BlockSpec((1, Cpad), lambda n: (0, 0)),
        ],
        out_specs=pl.BlockSpec((1, Ho * Ws, Cpad), lambda n: (n, 0, 0)),
        compiler_params=pltpu.CompilerParams(
            dimension_semantics=("parallel",),
            vmem_limit_bytes=32 * 1024 * 1024),
        cost_estimate=pl.CostEstimate(flops=int(flops), transcendentals=0,
                                      bytes_accessed=int(bytes_accessed)),
    )(x_s, w_k, shift_p)

    # Drop wrap-around columns and padded channel lanes (free XLA slicing).
    out = out.reshape(N, Ho, Ws, Cpad)[:, :, :Wo, :Cout]
    # TODO(synk): transpose kept only for NCHW parity with the PyTorch module.
    return out.transpose(0, 3, 1, 2)


def reference(x, weight, bias, gamma, beta, running_mean, running_var,
              *, stride=2, bn_eps=1e-5):
    y = jax.lax.conv_general_dilated(
        x, weight, window_strides=(stride, stride), padding="VALID",
        dimension_numbers=("NCHW", "OIHW", "NCHW"))
    y = y + bias[None, :, None, None]
    y = (y - running_mean[None, :, None, None]) / jnp.sqrt(
        running_var[None, :, None, None] + bn_eps)
    y = y * gamma[None, :, None, None] + beta[None, :, None, None]
    return jnp.maximum(y, 0.0)


if __name__ == "__main__":
    key = jax.random.PRNGKey(0)
    k_x, k_w, k_b, k_g, k_beta = jax.random.split(key, 5)

    N, Cin, H, W = 2, 4, 16, 16
    Cout, K, stride = 8, 3, 2

    x = jax.random.normal(k_x, (N, Cin, H, W), dtype=jnp.float32)
    weight = jax.random.normal(k_w, (Cout, Cin, K, K), dtype=jnp.float32) * 0.1
    bias = jax.random.normal(k_b, (Cout,), dtype=jnp.float32) * 0.1
    gamma = 1.0 + 0.1 * jax.random.normal(k_g, (Cout,), dtype=jnp.float32)
    beta = 0.1 * jax.random.normal(k_beta, (Cout,), dtype=jnp.float32)
    running_mean = jnp.zeros((Cout,), jnp.float32)
    running_var = jnp.ones((Cout,), jnp.float32)

    out = conv_block(x, weight, bias, gamma, beta, running_mean, running_var,
                     stride=stride, bn_eps=1e-5)
    out = jax.block_until_ready(out)

    ref = reference(x, weight, bias, gamma, beta, running_mean, running_var,
                    stride=stride, bn_eps=1e-5)
    assert out.shape == (N, Cout, (H - K) // stride + 1, (W - K) // stride + 1)
    # bf16 MXU operands (with BN scale folded into bf16 weights) vs f32 reference.
    assert jnp.allclose(out, ref, atol=2e-2, rtol=2e-2)

    print("KERNEL_OK")
</pallas_src>

<mosaic_0001>
module attributes {stable_mosaic.version = 11 : i64} {
  func.func @_convblock_kernel(%arg0: i32, %arg1: memref<4x72x4xbf16, #tpu.memory_space<vmem>>, %arg2: memref<9x4x128xbf16, #tpu.memory_space<vmem>>, %arg3: memref<1x128xf32, #tpu.memory_space<vmem>>, %arg4: memref<1x56x128xf32, #tpu.memory_space<vmem>>) attributes {dimension_semantics = [#tpu.dimension_semantics<parallel>], iteration_bounds = array<i64: 2>, scalar_prefetch = 0 : i64, scratch_operands = 0 : i64, tpu.core_type = #tpu.core_type<tc>, window_params = [{transform_indices = @transform_0, window_bounds = array<i64: 4, 72, 4>}, {pipeline_mode = #tpu.pipeline_mode<synchronous>, transform_indices = @transform_1, window_bounds = array<i64: 9, 4, 128>}, {pipeline_mode = #tpu.pipeline_mode<synchronous>, transform_indices = @transform_2, window_bounds = array<i64: 1, 128>}, {transform_indices = @transform_3, window_bounds = array<i64: 1, 56, 128>}]} {
    %cst = arith.constant 0.000000e+00 : f32
    %0 = vector.broadcast %cst : f32 to vector<56x128xf32>
    %c0 = arith.constant 0 : index
    %c0_0 = arith.constant 0 : index
    %c0_1 = arith.constant 0 : index
    %1 = vector.load %arg1[%c0, %c0_0, %c0_1] : memref<4x72x4xbf16, #tpu.memory_space<vmem>>, vector<1x56x4xbf16>
    %2 = vector.shape_cast %1 : vector<1x56x4xbf16> to vector<56x4xbf16>
    %c0_2 = arith.constant 0 : index
    %c0_3 = arith.constant 0 : index
    %c0_4 = arith.constant 0 : index
    %3 = vector.load %arg2[%c0_2, %c0_3, %c0_4] : memref<9x4x128xbf16, #tpu.memory_space<vmem>>, vector<1x4x128xbf16>
    %4 = vector.shape_cast %3 : vector<1x4x128xbf16> to vector<4x128xbf16>
    %cst_5 = arith.constant dense<0.000000e+00> : vector<56x128xf32>
    %5 = tpu.matmul %2, %4, %cst_5 {dimension_numbers = #tpu.dot_dimension_numbers<[1], [0], [0], [1], [0, 0, 1, 1], [], []>} : vector<56x4xbf16>, vector<4x128xbf16>, vector<56x128xf32> -> vector<56x128xf32>
    %6 = arith.addf %0, %5 : vector<56x128xf32>
    %c1 = arith.constant 1 : index
    %c0_6 = arith.constant 0 : index
    %c0_7 = arith.constant 0 : index
    %7 = vector.load %arg1[%c1, %c0_6, %c0_7] : memref<4x72x4xbf16, #tpu.memory_space<vmem>>, vector<1x56x4xbf16>
    %8 = vector.shape_cast %7 : vector<1x56x4xbf16> to vector<56x4xbf16>
    %c1_8 = arith.constant 1 : index
    %c0_9 = arith.constant 0 : index
    %c0_10 = arith.constant 0 : index
    %9 = vector.load %arg2[%c1_8, %c0_9, %c0_10] : memref<9x4x128xbf16, #tpu.memory_space<vmem>>, vector<1x4x128xbf16>
    %10 = vector.shape_cast %9 : vector<1x4x128xbf16> to vector<4x128xbf16>
    %cst_11 = arith.constant dense<0.000000e+00> : vector<56x128xf32>
    %11 = tpu.matmul %8, %10, %cst_11 {dimension_numbers = #tpu.dot_dimension_numbers<[1], [0], [0], [1], [0, 0, 1, 1], [], []>} : vector<56x4xbf16>, vector<4x128xbf16>, vector<56x128xf32> -> vector<56x128xf32>
    %12 = arith.addf %6, %11 : vector<56x128xf32>
    %c0_12 = arith.constant 0 : index
    %c1_13 = arith.constant 1 : index
    %c0_14 = arith.constant 0 : index
    %13 = vector.load %arg1[%c0_12, %c1_13, %c0_14] : memref<4x72x4xbf16, #tpu.memory_space<vmem>>, vector<1x56x4xbf16>
    %14 = vector.shape_cast %13 : vector<1x56x4xbf16> to vector<56x4xbf16>
    %c2 = arith.constant 2 : index
    %c0_15 = arith.constant 0 : index
    %c0_16 = arith.constant 0 : index
    %15 = vector.load %arg2[%c2, %c0_15, %c0_16] : memref<9x4x128xbf16, #tpu.memory_space<vmem>>, vector<1x4x128xbf16>
    %16 = vector.shape_cast %15 : vector<1x4x128xbf16> to vector<4x128xbf16>
    %cst_17 = arith.constant dense<0.000000e+00> : vector<56x128xf32>
    %17 = tpu.matmul %14, %16, %cst_17 {dimension_numbers = #tpu.dot_dimension_numbers<[1], [0], [0], [1], [0, 0, 1, 1], [], []>} : vector<56x4xbf16>, vector<4x128xbf16>, vector<56x128xf32> -> vector<56x128xf32>
    %18 = arith.addf %12, %17 : vector<56x128xf32>
    %c2_18 = arith.constant 2 : index
    %c0_19 = arith.constant 0 : index
    %c0_20 = arith.constant 0 : index
    %19 = vector.load %arg1[%c2_18, %c0_19, %c0_20] : memref<4x72x4xbf16, #tpu.memory_space<vmem>>, vector<1x56x4xbf16>
    %20 = vector.shape_cast %19 : vector<1x56x4xbf16> to vector<56x4xbf16>
    %c3 = arith.constant 3 : index
    %c0_21 = arith.constant 0 : index
    %c0_22 = arith.constant 0 : index
    %21 = vector.load %arg2[%c3, %c0_21, %c0_22] : memref<9x4x128xbf16, #tpu.memory_space<vmem>>, vector<1x4x128xbf16>
    %22 = vector.shape_cast %21 : vector<1x4x128xbf16> to vector<4x128xbf16>
    %cst_23 = arith.constant dense<0.000000e+00> : vector<56x128xf32>
    %23 = tpu.matmul %20, %22, %cst_23 {dimension_numbers = #tpu.dot_dimension_numbers<[1], [0], [0], [1], [0, 0, 1, 1], [], []>} : vector<56x4xbf16>, vector<4x128xbf16>, vector<56x128xf32> -> vector<56x128xf32>
    %24 = arith.addf %18, %23 : vector<56x128xf32>
    %c3_24 = arith.constant 3 : index
    %c0_25 = arith.constant 0 : index
    %c0_26 = arith.constant 0 : index
    %25 = vector.load %arg1[%c3_24, %c0_25, %c0_26] : memref<4x72x4xbf16, #tpu.memory_space<vmem>>, vector<1x56x4xbf16>
    %26 = vector.shape_cast %25 : vector<1x56x4xbf16> to vector<56x4xbf16>
    %c4 = arith.constant 4 : index
    %c0_27 = arith.constant 0 : index
    %c0_28 = arith.constant 0 : index
    %27 = vector.load %arg2[%c4, %c0_27, %c0_28] : memref<9x4x128xbf16, #tpu.memory_space<vmem>>, vector<1x4x128xbf16>
    %28 = vector.shape_cast %27 : vector<1x4x128xbf16> to vector<4x128xbf16>
    %cst_29 = arith.constant dense<0.000000e+00> : vector<56x128xf32>
    %29 = tpu.matmul %26, %28, %cst_29 {dimension_numbers = #tpu.dot_dimension_numbers<[1], [0], [0], [1], [0, 0, 1, 1], [], []>} : vector<56x4xbf16>, vector<4x128xbf16>, vector<56x128xf32> -> vector<56x128xf32>
    %30 = arith.addf %24, %29 : vector<56x128xf32>
    %c2_30 = arith.constant 2 : index
    %c1_31 = arith.constant 1 : index
    %c0_32 = arith.constant 0 : index
    %31 = vector.load %arg1[%c2_30, %c1_31, %c0_32] : memref<4x72x4xbf16, #tpu.memory_space<vmem>>, vector<1x56x4xbf16>
    %32 = vector.shape_cast %31 : vector<1x56x4xbf16> to vector<56x4xbf16>
    %c5 = arith.constant 5 : index
    %c0_33 = arith.constant 0 : index
    %c0_34 = arith.constant 0 : index
    %33 = vector.load %arg2[%c5, %c0_33, %c0_34] : memref<9x4x128xbf16, #tpu.memory_space<vmem>>, vector<1x4x128xbf16>
    %34 = vector.shape_cast %33 : vector<1x4x128xbf16> to vector<4x128xbf16>
    %cst_35 = arith.constant dense<0.000000e+00> : vector<56x128xf32>
    %35 = tpu.matmul %32, %34, %cst_35 {dimension_numbers = #tpu.dot_dimension_numbers<[1], [0], [0], [1], [0, 0, 1, 1], [], []>} : vector<56x4xbf16>, vector<4x128xbf16>, vector<56x128xf32> -> vector<56x128xf32>
    %36 = arith.addf %30, %35 : vector<56x128xf32>
    %c0_36 = arith.constant 0 : index
    %c8 = arith.constant 8 : index
    %c0_37 = arith.constant 0 : index
    %37 = vector.load %arg1[%c0_36, %c8, %c0_37] : memref<4x72x4xbf16, #tpu.memory_space<vmem>>, vector<1x56x4xbf16>
    %38 = vector.shape_cast %37 : vector<1x56x4xbf16> to vector<56x4xbf16>
    %c6 = arith.constant 6 : index
    %c0_38 = arith.constant 0 : index
    %c0_39 = arith.constant 0 : index
    %39 = vector.load %arg2[%c6, %c0_38, %c0_39] : memref<9x4x128xbf16, #tpu.memory_space<vmem>>, vector<1x4x128xbf16>
    %40 = vector.shape_cast %39 : vector<1x4x128xbf16> to vector<4x128xbf16>
    %cst_40 = arith.constant dense<0.000000e+00> : vector<56x128xf32>
    %41 = tpu.matmul %38, %40, %cst_40 {dimension_numbers = #tpu.dot_dimension_numbers<[1], [0], [0], [1], [0, 0, 1, 1], [], []>} : vector<56x4xbf16>, vector<4x128xbf16>, vector<56x128xf32> -> vector<56x128xf32>
    %42 = arith.addf %36, %41 : vector<56x128xf32>
    %c1_41 = arith.constant 1 : index
    %c8_42 = arith.constant 8 : index
    %c0_43 = arith.constant 0 : index
    %43 = vector.load %arg1[%c1_41, %c8_42, %c0_43] : memref<4x72x4xbf16, #tpu.memory_space<vmem>>, vector<1x56x4xbf16>
    %44 = vector.shape_cast %43 : vector<1x56x4xbf16> to vector<56x4xbf16>
    %c7 = arith.constant 7 : index
    %c0_44 = arith.constant 0 : index
    %c0_45 = arith.constant 0 : index
    %45 = vector.load %arg2[%c7, %c0_44, %c0_45] : memref<9x4x128xbf16, #tpu.memory_space<vmem>>, vector<1x4x128xbf16>
    %46 = vector.shape_cast %45 : vector<1x4x128xbf16> to vector<4x128xbf16>
    %cst_46 = arith.constant dense<0.000000e+00> : vector<56x128xf32>
    %47 = tpu.matmul %44, %46, %cst_46 {dimension_numbers = #tpu.dot_dimension_numbers<[1], [0], [0], [1], [0, 0, 1, 1], [], []>} : vector<56x4xbf16>, vector<4x128xbf16>, vector<56x128xf32> -> vector<56x128xf32>
    %48 = arith.addf %42, %47 : vector<56x128xf32>
    %c0_47 = arith.constant 0 : index
    %c9 = arith.constant 9 : index
    %c0_48 = arith.constant 0 : index
    %49 = vector.load %arg1[%c0_47, %c9, %c0_48] : memref<4x72x4xbf16, #tpu.memory_space<vmem>>, vector<1x56x4xbf16>
    %50 = vector.shape_cast %49 : vector<1x56x4xbf16> to vector<56x4xbf16>
    %c8_49 = arith.constant 8 : index
    %c0_50 = arith.constant 0 : index
    %c0_51 = arith.constant 0 : index
    %51 = vector.load %arg2[%c8_49, %c0_50, %c0_51] : memref<9x4x128xbf16, #tpu.memory_space<vmem>>, vector<1x4x128xbf16>
    %52 = vector.shape_cast %51 : vector<1x4x128xbf16> to vector<4x128xbf16>
    %cst_52 = arith.constant dense<0.000000e+00> : vector<56x128xf32>
    %53 = tpu.matmul %50, %52, %cst_52 {dimension_numbers = #tpu.dot_dimension_numbers<[1], [0], [0], [1], [0, 0, 1, 1], [], []>} : vector<56x4xbf16>, vector<4x128xbf16>, vector<56x128xf32> -> vector<56x128xf32>
    %54 = arith.addf %48, %53 : vector<56x128xf32>
    %c0_53 = arith.constant 0 : index
    %c0_54 = arith.constant 0 : index
    %55 = vector.load %arg3[%c0_53, %c0_54] : memref<1x128xf32, #tpu.memory_space<vmem>>, vector<1x128xf32>
    %56 = vector.broadcast %55 : vector<1x128xf32> to vector<56x128xf32>
    %57 = arith.addf %54, %56 : vector<56x128xf32>
    %cst_55 = arith.constant 0.000000e+00 : f32
    %58 = vector.broadcast %cst_55 : f32 to vector<56x128xf32>
    %59 = arith.maximumf %57, %58 : vector<56x128xf32>
    %c0_56 = arith.constant 0 : index
    %c0_57 = arith.constant 0 : index
    %c0_58 = arith.constant 0 : index
    %60 = vector.load %arg4[%c0_56, %c0_57, %c0_58] : memref<1x56x128xf32, #tpu.memory_space<vmem>>, vector<1x56x128xf32>
    %61 = vector.shape_cast %60 : vector<1x56x128xf32> to vector<56x128xf32>
    %62 = vector.shape_cast %59 : vector<56x128xf32> to vector<1x56x128xf32>
    tpu.vector_store %arg4[%c0_56, %c0_57, %c0_58], %62 {strides = array<i32>} : memref<1x56x128xf32, #tpu.memory_space<vmem>>, vector<1x56x128xf32>,
    return
  }
  func.func @transform_0(%arg0: i32) -> (i32, i32, i32) {
    %c0_i32 = arith.constant 0 : i32
    %c0_i32_0 = arith.constant 0 : i32
    %c0_i32_1 = arith.constant 0 : i32
    return %arg0, %c0_i32, %c0_i32_0 : i32, i32, i32
  }
  func.func @transform_1(%arg0: i32) -> (i32, i32, i32) {
    %c0_i32 = arith.constant 0 : i32
    %c0_i32_0 = arith.constant 0 : i32
    %c0_i32_1 = arith.constant 0 : i32
    %c0_i32_2 = arith.constant 0 : i32
    return %c0_i32, %c0_i32_0, %c0_i32_1 : i32, i32, i32
  }
  func.func @transform_2(%arg0: i32) -> (i32, i32) {
    %c0_i32 = arith.constant 0 : i32
    %c0_i32_0 = arith.constant 0 : i32
    %c0_i32_1 = arith.constant 0 : i32
    return %c0_i32, %c0_i32_0 : i32, i32
  }
  func.func @transform_3(%arg0: i32) -> (i32, i32, i32) {
    %c0_i32 = arith.constant 0 : i32
    %c0_i32_0 = arith.constant 0 : i32
    %c0_i32_1 = arith.constant 0 : i32
    return %arg0, %c0_i32, %c0_i32_0 : i32, i32, i32
  }
}

</mosaic_0001>

<bundles_post_ra>
// kernel: tpu_custom_call.1
= control target key start
LH: loop header
LB: loop body
LE: loop exit
PB: predicated region body
PF: predicated region fallthrough
CT: control target
= control target key end

     0   :  { %8 = vsyncpa [#allocation3], 0  ;;  %s2110_s0 = inlined_call_operand.vmem [shape: bf16[8,72,4], index: 0, kind: input, shape index: {}]   ;;  %s2111_s1 = inlined_call_operand.vmem [shape: bf16[9,4,128], index: 1, kind: input, shape index: {}]   ;;  %s2112_s2 = inlined_call_operand.vmem [shape: f32[1,128], index: 2, kind: input, shape index: {}]   ;;  %s2113_s3 = inlined_call_operand.hbm [shape: f32[2,56,128], index: 3, kind: output, shape index: {}]  }
   0x1   :  { %10 = vsyncpa [#allocation3 + $0x1], 0  ;;  %s1843_s12 = smov 0   ;;  %s1845_s13 = smov 0  }
   0x2   :  { %s1847_s14 = smov 0   ;;  %s1849_s15 = smov 0  }
   0x3 LB: > { %s1864_s16 = sadd.s32 4294967295, %s1818_s15   ;;  %s1371_s17 = sadd.s32 4294967294, %s1818_s15   ;;  %s1818_s15 = sphi %s1849_s15, %s2119_s15   ;;  %s1814_s14 = sphi %s1847_s14, %s2118_s14   ;;  %s1810_s13 = sphi %s1845_s13, %s2117_s13   ;;  %s1806_s12 = sphi %s1843_s12, %s2116_s12  }
   0x4   : > { %s1868_s18 = sadd.s32 1, %s1818_s15   ;;  %s91_s19 = sadd.s32 1, %s1814_s14 }
   0x5   : > { %s88_s20 = ssub.s32 %s1818_s15, %s1868_s18  ;;  %p101_p0 = scmp.ne.s32.totalorder %s1814_s14, %s1810_s13 }
   0x6   : > { %p89_p1 = scmp.eq.s32.totalorder %s88_s20, 0  ;;  %p102_p2 = scmp.eq.s32.totalorder %s1864_s16, 1 }
   0x7   : > { %p107_p3 = scmp.ne.s32.totalorder %s1810_s13, %s1806_s12  ;;  %p108_p4 = scmp.eq.s32.totalorder %s1371_s17, 1 }
   0x8   : > { %s1879_s21 = scalar_select %p89_p1, %s1814_s14, %s91_s19  }
   0x9   : > { %p1881_p5 = por %p102_p2, %p101_p0  ;;  %p1885_p6 = por %p108_p4, %p107_p3 }
   0xa   : > { %p1374_p7 = scmp.ge.s32.totalorder %s1818_s15, 1  ;;  %p142_p8 = scmp.lt.s32.totalorder %s1818_s15, 3 }
   0xc   : > { %p143_p9 = pnand %p1374_p7, %p142_p8 }
   0xd   : > { %v1384_v0 = vld [vmem:[%s2111_s1 + $0x2] sm:$0x3] (!%p143_p9)  ;;  %vm224_vm0 = vcmask (!%p143_p9), 1041408   ;;  %v1897_v1 = vld [vmem:[%s2111_s1 + $0x8] sm:$0x3] (!%p143_p9)  ;;  %s1375_s28 = sshll.u32 (!%p143_p9), %s1864_s16, 2 }
   0xe   : > { %146 = sbr.rel (%p143_p9) target bundleno = 335 (0x14f), region = 32  ;;  %1666 = vmatprep.subr.msk.bf16.mxu1 (!%p143_p9), %vm224_vm0, %v1384_v0  ;;  %v226_v2 = vsel (!%p143_p9), %vm224_vm0, %v1384_v0, 0  ;;  %1670 = vmatprep.subr.msk.bf16.mxu0 (!%p143_p9), %vm224_vm0, %v1897_v1  ;;  %v1906_v3 = vsel (!%p143_p9), %vm224_vm0, %v1897_v1, 0  ;;  %p168_p10 = scmp.lt.s32.totalorder (!%p143_p9), %s1375_s28, 7  ;;  %v182_v4 = vld [vmem:[%s2111_s1] sm:$0x3] (!%p143_p9) }
   0xf   : > { %1543 = vmatpush3.bf16.msra.mxu1 (!%p143_p9), %v226_v2  ;;  %1583 = vmatpush3.bf16.msra.mxu0 (!%p143_p9), %v1906_v3  ;;  %v1450_v5 = vld [vmem:[%s2111_s1 + $0xa] sm:$0x3] (!%p143_p9)  ;;  %vm211_vm1 = vcmask (!%p143_p9), 31744   ;;  %v323_v9 = vsel (!%p143_p9), %vm224_vm0, %v182_v4, 0  ;;  %v1401_v10 = vld [vmem:[%s2111_s1 + $0x4] sm:$0x3] (!%p143_p9) }
  0x10   : > { %1667 = vmatprep.subr.msk.bf16.mxu1 (!%p143_p9), %vm224_vm0, %v182_v4  ;;  %1672 = vmatprep.subr.msk.bf16.mxu0 (!%p143_p9), %vm224_vm0, %v1450_v5  ;;  %v1459_v11 = vld [vmem:[%s2111_s1 + $0xc] sm:$0x3] (!%p143_p9)  ;;  %v839_v13 = vsel (!%p143_p9), %vm224_vm0, %v1450_v5, 0  ;;  %vm419_vm2 = vsmask.f32 (!%p143_p9), 7424  ;;  %v464_v32 = vsel (!%p143_p9), %vm224_vm0, %v1401_v10, 0 }
  0x11   : > { %v934_v33 = vsel (!%p143_p9), %vm224_vm0, %v1459_v11, 0  ;;  %v1475_v48 = vld [vmem:[%s2111_s1 + $0xe] sm:$0x3] (!%p143_p9)  ;;  %v1417_v51 = vld [vmem:[%s2111_s1 + $0x6] sm:$0x3] (!%p143_p9)  ;;  %s164_s29 = sand.u32 (!%p143_p9), 1, %s1810_s13  }
  0x12   : > { %s1676_s30 = smul.u32 (!%p143_p9), 56, %s164_s29  ;;  %s1820_s19 = smov (!%p143_p9), [#allocation2]  }
  0x13   : > { %s1678_s7 = smul.u32 (!%p143_p9), 896, %s1864_s16  ;;  %s2069_s16 = scalar_lea.sflag (!%p143_p9), [#allocation3], %s164_s29 }
  0x14   : > { %s1760_s20 = sshll.u32 (!%p143_p9), %s1820_s19, 4  ;;  %s1761_s20 = int_to_ptr.vmem [resolvable:$false] %s1760_s20 }
  0x15   : > { %s2121_s28 = smov (!%p168_p10, %s1375_s28), 7  ;;  %s2061_s11 = scalar_lea.hbm %s2113_s3, %s1678_s7 }
  0x16   : > { %s1677_s6 = smul.u32 36, %s2121_s28  ;;  %s1762_s24 = scalar_lea.vmem %s1761_s20, 1792 }
  0x18   : > { %s1920_s9 = scalar_lea.vmem %s2110_s0, %s1677_s6  ;;  %s2046_s6 = scalar_lea.vmem [#allocation2], %s1676_s30 }
  0x19   : > { %v1720_v6 = vld [vmem:[%s1920_s9 + $0x24] sm:$0xff]   ;;  %v1721_v7 = vld [vmem:[%s1920_s9 + $0x6c] sm:$0xff]   ;;  %v1723_v12 = vld [vmem:[%s1920_s9 + $0x74] sm:$0xff]   ;;  %s1309_s8 = sshll.u32 %s2046_s6, 4  ;;  %s2064_s8 = int_to_ptr.vmem [resolvable:$true] %s1309_s8 }
  0x1a   : > { %1544 = vmatprep.mubr.msk.bf16.mxu1 %vm211_vm1, %v1720_v6  ;;  %v1722_v8 = vld [vmem:[%s1920_s9 + $0x2c] sm:$0xff]   ;;  %1584 = vmatprep.mubr.msk.bf16.mxu0 %vm211_vm1, %v1721_v7  ;;  %v1724_v14 = vld [vmem:[%s1920_s9 + $0x34] sm:$0xff]   ;;  %v1725_v15 = vld [vmem:[%s1920_s9 + $0x3c] ss:$0 sps:$4 sm:$0xff]   ;;  %s1756_s17 = scalar_lea.vmem %s2064_s8, 896  ;;  %p1763_p0 = scmp.lt.s32.totalorder %s2064_s8, %s1761_s20 }
  0x1b   : > { %1545 = vmatmul.mubr.msk.bf16.vlgmr.msra.gmra.mrb[0].mxu1 %vm211_vm1, %v1722_v8  ;;  %1585 = vmatmul.mubr.msk.bf16.vlgmr.msra.gmra.mrb[0].mxu0 %vm211_vm1, %v1723_v12  ;;  %v1726_v16 = vld [vmem:[%s1920_s9 + $0x48] sm:$0xff]   ;;  %v1727_v17 = vld [vmem:[%s1920_s9 + $0x50] sm:$0xff]   ;;  %v1728_v18 = vld [vmem:[%s1920_s9 + $0x58] sm:$0xff]   ;;  %p1757_p11 = scmp.ne.s32.totalorder %s2064_s8, %s1756_s17  ;;  %p1764_p1 = scmp.lt.s32.totalorder %s1762_s24, %s1756_s17 }
  0x1c   : > { %1553 = vmatpush3.bf16.msra.mxu1 %v323_v9  ;;  %1593 = vmatpush3.bf16.msra.mxu0 %v839_v13  ;;  %v796_v19 = vshrl.u32 %v1726_v16, 16  ;;  %v798_v20 = vshll.u32 %v1726_v16, 16  ;;  %v803_v21 = vshll.u32 %v1727_v17, 16  ;;  %v807_v22 = vshrl.u32 %v1727_v17, 16  ;;  %v1729_v24 = vld [vmem:[%s1920_s9] sm:$0xff]   ;;  %v1730_v42 = vld [vmem:[%s1920_s9 + $0x8] sm:$0xff]  }
  0x1d   : > { %1548 = vmatprep.mubr.msk.bf16.mxu1 %vm211_vm1, %v1724_v14  ;;  %1668 = vmatprep.subr.msk.bf16.mxu1 %vm224_vm0, %v1401_v10  ;;  %v811_v23 = vshll.u32 %v1728_v18, 16  ;;  %v815_v27 = vshrl.u32 %v1728_v18, 16  ;;  %v1731_v29 = vld [vmem:[%s1920_s9 + $0x60] sm:$0x1f]   ;;  %v391_v40 = vld [vmem:[%s1920_s9 + $0x8] sm:$0xf]  ;;  %p1758_p12 = pnand %p1757_p11, %p1881_p5  ;;  %p1765_p2 = por %p1764_p1, %p1763_p0 }
  0x1e   : > { %1673 = vmatprep.subr.msk.bf16.mxu0 %vm224_vm0, %v1459_v11  ;;  %v800_v25 = vrot.slane %v798_v20, 1  ;;  %v805_v26 = vrot.slane %v803_v21, 1  ;;  %v819_v35 = vshll.u32 %v1731_v29, 16  ;;  %v389_v36 = vld [vmem:[%s1920_s9] sm:$0xf]  ;;  %v823_v44 = vshrl.u32 %v1731_v29, 16 }
  0x1f   : > { %v813_v28 = vrot.slane %v811_v23, 1  ;;  %v390_v39 = vld [vmem:[%s1920_s9 + $0x4] sm:$0xf]  ;;  %v392_v41 = vld [vmem:[%s1920_s9 + $0xc] sm:$0xf]  ;;  %v1732_v45 = vld [vmem:[%s1920_s9 + $0x10] sm:$0xff]   ;;  %p1759_p13 = pneg %p1758_p12 }
  0x20   : > { %v801_v30 = vor.u32 %v800_v25, %v796_v19  ;;  %v809_v31 = vor.u32 %v807_v22, %v805_v26  ;;  %v821_v43 = vrot.slane %v819_v35, 1  ;;  %v1402_v46 = vcombine.low %v389_v36, %v390_v39  ;;  %v393_v49 = vld [vmem:[%s1920_s9 + $0x10] sm:$0xf]  ;;  %v394_v50 = vld [vmem:[%s1920_s9 + $0x14] sm:$0xf]  ;;  %v1742_v22 = vld [vmem:[%s1920_s9 + $0x28] sm:$0xff]  }
  0x21   : > { %v817_v34 = vor.u32 %v815_v27, %v813_v28  ;;  %v1403_v47 = vcombine.low %v391_v40, %v392_v41  ;;  %v395_v53 = vld [vmem:[%s1920_s9 + $0x18] sm:$0xf]  ;;  %v396_v54 = vld [vmem:[%s1920_s9 + $0x1c] sm:$0x1]  ;;  %v1404_v58 = vcombine.low %v393_v49, %v394_v50  ;;  %v1460_v61 = vcombine.low %v390_v39, %v391_v40  ;;  %v1484_v16 = vld [vmem:[%s2111_s1 + $0x10] sm:$0x3]  ;;  %p1766_p3 = pnand %p1765_p2, %p1759_p13 }
  0x22   : > { %v806_v37 = vsel %vm419_vm2, %v801_v30, %v805_v26  ;;  %v814_v38 = vsel %vm419_vm2, %v809_v31, %v813_v28  ;;  %v421_v55 = vshrl.u32 %v1402_v46, 16  ;;  %v423_v56 = vshll.u32 %v1402_v46, 16  ;;  %v1733_v0 = vld [vmem:[%s1920_s9 + $0x18] ss:$0 sps:$4 sm:$0xff]   ;;  %v1741_v21 = vld [vmem:[%s1920_s9 + $0x1c] ss:$0 sps:$4 sm:$0xff]  }
  0x23   : > { %1549 = vmatmul.mubr.msk.bf16.gmra.mrb[4].mxu1 %vm211_vm1, %v1725_v15  ;;  %1594 = vmatprep.mubr.msk.bf16.mxu0 %vm211_vm1, %v806_v37  ;;  %v822_v52 = vsel %vm419_vm2, %v817_v34, %v821_v43  ;;  %v428_v57 = vshll.u32 %v1403_v47, 16  ;;  %v825_v59 = vor.u32 %v823_v44, %v821_v43  ;;  %v1405_v63 = vcombine.low %v395_v53, %v396_v54  ;;  %v1750_v23 = vld [vmem:[%s1920_s9 + $0x4] sm:$0xff]   ;;  %v1751_v26 = vld [vmem:[%s1920_s9 + $0xc] sm:$0xff]   ;;  %v1746_v29 = vld [vmem:[%s1920_s9 + $0x38] sm:$0xff]  }
  0x24   : > { %1554 = vmatprep.mubr.msk.bf16.mxu1 %vm211_vm1, %v1729_v24  ;;  %v425_v60 = vrot.slane %v423_v56, 1  ;;  %v436_v4 = vshll.u32 %v1404_v58, 16  ;;  %v432_v5 = vshrl.u32 %v1403_v47, 16  ;;  %v440_v7 = vshrl.u32 %v1404_v58, 16  ;;  %v1744_v25 = vld [vmem:[%s1920_s9 + $0x48] sm:$0xff]   ;;  %v1743_v28 = vld [vmem:[%s1920_s9 + $0x30] sm:$0xff]  }
  0x25   : > { %v430_v62 = vrot.slane %v428_v57, 1  ;;  %v444_v8 = vshll.u32 %v1405_v63, 16  ;;  %v1461_v10 = vcombine.low %v392_v41, %v393_v49  ;;  %v1462_v12 = vcombine.low %v394_v50, %v395_v53  ;;  %v1748_v34 = vld [vmem:[%s1920_s9 + $0x58] sm:$0xff]   ;;  %v1747_v39 = vld [vmem:[%s1920_s9 + $0x40] ss:$0 sps:$4 sm:$0xff]  }
  0x26   : > { %v426_v2 = vor.u32 %v425_v60, %v421_v55  ;;  %v438_v9 = vrot.slane %v436_v4, 1  ;;  %v1047_v15 = vsel %vm224_vm0, %v1475_v48, 0  ;;  %v578_v18 = vsel %vm224_vm0, %v1417_v51, 0  ;;  %v1752_v35 = vld [vmem:[%s1920_s9 + $0x14] sm:$0xff]   ;;  %v1753_v47 = vld [vmem:[%s1920_s9 + $0x7c] sm:$0xff]  }
  0x27   : > { %1595 = vmatmul.mubr.msk.bf16.vlgmr.msra.gmra.mrb[0].mxu0 %vm211_vm1, %v814_v38  ;;  %v434_v11 = vor.u32 %v432_v5, %v430_v62  ;;  %v446_v14 = vrot.slane %v444_v8, 1  ;;  %v448_v20 = vshrl.u32 %v1405_v63, 16  ;;  %v1153_v27 = vshll.u32 %v1750_v23, 16  ;;  %v1755_v38 = vld [vmem:[%s1920_s9 + $0x1c] sm:$0x1f]  }
  0x28   : > { %1603 = vmatpush3.bf16.msra.mxu0 %v934_v33  ;;  %1598 = vmatprep.mubr.msk.bf16.mxu0 %vm211_vm1, %v822_v52  ;;  %v431_v6 = vsel %vm419_vm2, %v426_v2, %v430_v62  ;;  %v442_v13 = vor.u32 %v440_v7, %v438_v9  ;;  %v1151_v30 = vshrl.u32 %v1750_v23, 16  ;;  %v1745_v33 = vld [vmem:[%s1920_s9 + $0x50] sm:$0xff]   ;;  %v1166_v40 = vshll.u32 %v1752_v35, 16  ;;  %v1754_v52 = vld [vmem:[%s1920_s9 + $0x84] ss:$0 sps:$4 sm:$0xff]  }
  0x29   : > { %1674 = vmatprep.subr.msk.bf16.mxu0 %vm224_vm0, %v1475_v48  ;;  %v439_v17 = vsel %vm419_vm2, %v434_v11, %v438_v9  ;;  %v450_v24 = vor.u32 %v448_v20, %v446_v14  ;;  %v1155_v31 = vrot.slane %v1153_v27, 1  ;;  %v1162_v41 = vshrl.u32 %v1751_v26, 16 }
  0x2a   : > { %v447_v19 = vsel %vm419_vm2, %v442_v13, %v446_v14  ;;  %v1170_v43 = vshrl.u32 %v1752_v35, 16  ;;  %v1174_v44 = vshll.u32 %v1755_v38, 16  ;;  %v1168_v46 = vrot.slane %v1166_v40, 1 }
  0x2b   : > { %1555 = vmatmul.mubr.msk.bf16.vlgmr.msra.gmra.mrb[0].mxu1 %vm211_vm1, %v1730_v42  ;;  %v1156_v36 = vor.u32 %v1155_v31, %v1151_v30  ;;  %v1178_v53 = vshrl.u32 %v1755_v38, 16 }
  0x2c   : > { %1563 = vmatpush3.bf16.msra.mxu1 %v464_v32  ;;  %1558 = vmatprep.mubr.msk.bf16.mxu1 %vm211_vm1, %v1732_v45  ;;  %v1158_v32 = vshll.u32 %v1751_v26, 16  ;;  %v1749_v45 = vld [vmem:[%s1920_s9 + $0x60] ss:$0 sps:$4 sm:$0xff]   ;;  %v1172_v49 = vor.u32 %v1170_v43, %v1168_v46 }
  0x2d   : > { %1669 = vmatprep.subr.msk.bf16.mxu1 %vm224_vm0, %v1417_v51 }
  0x2e   : > { %v1160_v37 = vrot.slane %v1158_v32, 1 }
  0x2f   : > { %1599 = vmatmul.mubr.msk.bf16.gmra.mrb[4].mxu0 %vm211_vm1, %v825_v59 }
  0x30   : > { %1604 = vmatprep.mubr.msk.bf16.mxu0 %vm211_vm1, %v1460_v61  ;;  %v1161_v42 = vsel %vm419_vm2, %v1156_v36, %v1160_v37  ;;  %v1164_v48 = vor.u32 %v1162_v41, %v1160_v37 }
  0x32   : > { %v1169_v50 = vsel %vm419_vm2, %v1164_v48, %v1168_v46 }
  0x33   : > { %1559 = vmatmul.mubr.msk.bf16.gmra.mrb[8].mxu1 %vm211_vm1, %v1733_v0 }
  0x34   : > { %1564 = vmatprep.mubr.msk.bf16.mxu1 %vm211_vm1, %v431_v6 }
  0x37   : > { %1605 = vmatmul.mubr.msk.bf16.vlgmr.msra.gmra.mrb[0].mxu0 %vm211_vm1, %v1461_v10 }
  0x38   : > { %1613 = vmatpush3.bf16.msra.mxu0 %v1047_v15  ;;  %1608 = vmatprep.mubr.msk.bf16.mxu0 %vm211_vm1, %v1462_v12 }
  0x39   : > { %1675 = vmatprep.subr.msk.bf16.mxu0 %vm224_vm0, %v1484_v16 }
  0x3b   : > { %1565 = vmatmul.mubr.msk.bf16.vlgmr.msra.gmra.mrb[0].mxu1 %vm211_vm1, %v439_v17 }
  0x3c   : > { %1573 = vmatpush3.bf16.msra.mxu1 %v578_v18  ;;  %1568 = vmatprep.mubr.msk.bf16.mxu1 %vm211_vm1, %v447_v19 }
  0x3d   : > { %1671 = vmatprep.subr.msk.bf16.mxu1 %vm224_vm0, %v1897_v1  ;;  %v1194_v1 = vsel %vm224_vm0, %v1484_v16, 0 }
  0x3f   : > { %1609 = vmatmul.mubr.msk.bf16.gmra.mrb[8].mxu0 %vm211_vm1, %v1741_v21 }
  0x40   : > { %1614 = vmatprep.mubr.msk.bf16.mxu0 %vm211_vm1, %v1742_v22 }
  0x43   : > { %1569 = vmatmul.mubr.msk.bf16.gmra.mrb[12].mxu1 %vm211_vm1, %v450_v24 }
  0x44   : > { %1574 = vmatprep.mubr.msk.bf16.mxu1 %vm211_vm1, %v1744_v25 }
  0x47   : > { %1615 = vmatmul.mubr.msk.bf16.vlgmr.msra.gmra.mrb[0].mxu0 %vm211_vm1, %v1743_v28 }
  0x48   : > { %1623 = vmatpush3.bf16.msra.mxu0 %v1194_v1  ;;  %1618 = vmatprep.mubr.msk.bf16.mxu0 %vm211_vm1, %v1746_v29 }
  0x4b   : > { %1575 = vmatmul.mubr.msk.bf16.vlgmr.msra.gmra.mrb[0].mxu1 %vm211_vm1, %v1745_v33 }
  0x4c   : > { %1633 = vmatpush3.bf16.msra.mxu1 %v1906_v3  ;;  %1578 = vmatprep.mubr.msk.bf16.mxu1 %vm211_vm1, %v1748_v34  ;;  %v1176_v3 = vrot.slane %v1174_v44, 1  ;;  %v1493_v34 = vld [vmem:[%s2112_s2] ss:$0 sm:$0xff] }
  0x4e   : > { %v1177_v51 = vsel %vm419_vm2, %v1172_v49, %v1176_v3  ;;  %v1180_v54 = vor.u32 %v1178_v53, %v1176_v3 }
  0x4f   : > { %1619 = vmatmul.mubr.msk.bf16.gmra.mrb[12].mxu0 %vm211_vm1, %v1747_v39 }
  0x50   : > { %1624 = vmatprep.mubr.msk.bf16.mxu0 %vm211_vm1, %v1161_v42 }
  0x53   : > { %1579 = vmatmul.mubr.msk.bf16.gmra.mrb[16].mxu1 %vm211_vm1, %v1749_v45 }
  0x54   : > { %1588 = vmatprep.mubr.msk.bf16.mxu1 %vm211_vm1, %v1753_v47 }
  0x57   : > { %1625 = vmatmul.mubr.msk.bf16.vlgmr.msra.gmra.mrb[0].mxu0 %vm211_vm1, %v1169_v50 }
  0x58   : > { %1628 = vmatprep.mubr.msk.bf16.mxu0 %vm211_vm1, %v1177_v51 }
  0x5b   : > { %1589 = vmatmul.mubr.msk.bf16.vlgmr.msra.gmra.mrb[20].mxu1 %vm211_vm1, %v1754_v52 }
  0x5f   : > { %1629 = vmatmul.mubr.msk.bf16.gmra.mrb[16].mxu0 %vm211_vm1, %v1180_v54 }
  0xf6   : > { %v1550_v55 = vpop.f32.mrb[4].mxu1 }
  0xf7   : > { %v278_v56 = vpop.f32.mrb[5].mxu1 }
  0xf8   : > { %v1551_v57 = vpop.f32.mrb[6].mxu1 }
  0xf9   : > { %v281_v58 = vpop.f32.mrb[7].mxu1 }
 0x102   : > { %v1600_v59 = vpop.f32.mrb[4].mxu0 }
 0x103   : > { %v2034_v60 = vpop.f32.mrb[5].mxu0 }
 0x104   : > { %v1601_v61 = vpop.f32.mrb[6].mxu0 }
 0x105   : > { %v2036_v63 = vpop.f32.mrb[7].mxu0 }
 0x106   : > { %v1560_v62 = vpop.f32.mrb[8].mxu1 }
 0x107   : > { %v384_v0 = vadd.f32 %v1560_v62, %v1550_v55  ;;  %v375_v2 = vpop.f32.mrb[9].mxu1 }
 0x108   : > { %v376_v4 = vadd.f32 %v375_v2, %v278_v56  ;;  %v1561_v5 = vpop.f32.mrb[10].mxu1 }
 0x109   : > { %v378_v6 = vpop.f32.mrb[11].mxu1 }
 0x10a   : > { %v379_v7 = vadd.f32 %v378_v6, %v281_v58 }
 0x112   : > { %v1610_v8 = vpop.f32.mrb[8].mxu0 }
 0x113   : > { %v986_v9 = vpop.f32.mrb[9].mxu0 }
 0x114   : > { %v1611_v10 = vpop.f32.mrb[10].mxu0 }
 0x115   : > { %v2038_v12 = vpop.f32.mrb[11].mxu0 }
 0x116   : > { %v1570_v11 = vpop.f32.mrb[12].mxu1 }
 0x117   : > { %v536_v13 = vadd.f32 %v1570_v11, %v384_v0  ;;  %v516_v14 = vpop.f32.mrb[13].mxu1 }
 0x118   : > { %v534_v15 = vadd.f32 %v516_v14, %v376_v4  ;;  %v1571_v16 = vpop.f32.mrb[14].mxu1 }
 0x119   : > { %v519_v17 = vpop.f32.mrb[15].mxu1 }
 0x11a   : > { %v535_v18 = vadd.f32 %v519_v17, %v379_v7 }
 0x11e   : > { %v1576_v19 = vpop.f32.mrb[0].mxu1 }
 0x11f   : > { %v614_v20 = vpop.f32.mrb[1].mxu1 }
 0x120   : > { %v1577_v21 = vpop.f32.mrb[2].mxu1 }
 0x121   : > { %v617_v22 = vpop.f32.mrb[3].mxu1 }
 0x122   : > { %v1620_v23 = vpop.f32.mrb[12].mxu0 }
 0x123   : > { %v1099_v24 = vpop.f32.mrb[13].mxu0 }
 0x124   : > { %v1621_v25 = vpop.f32.mrb[14].mxu0 }
 0x125   : > { %v1102_v27 = vpop.f32.mrb[15].mxu0 }
 0x126   : > { %v1580_v26 = vpop.f32.mrb[16].mxu1 }
 0x127   : > { %v650_v28 = vadd.f32 %v1580_v26, %v536_v13  ;;  %v630_v29 = vpop.f32.mrb[17].mxu1 }
 0x128   : > { %v648_v1 = vadd.f32 %v630_v29, %v534_v15  ;;  %v1581_v30 = vpop.f32.mrb[18].mxu1 }
 0x129   : > { %v633_v31 = vpop.f32.mrb[19].mxu1 }
 0x12a   : > { %v649_v32 = vadd.f32 %v633_v31, %v535_v18  ;;  %v1626_v33 = vpop.f32.mrb[0].mxu0 }
 0x12b   : > { %v1634_v35 = vadd.f32 %v1626_v33, %v1576_v19  ;;  %v1230_v36 = vpop.f32.mrb[1].mxu0 }
 0x12c   : > { %v1635_v37 = vadd.f32 %v1230_v36, %v614_v20  ;;  %v1627_v38 = vpop.f32.mrb[2].mxu0 }
 0x12d   : > { %v1276_v39 = vadd.f32 %v1634_v35, %v1493_v34  ;;  %v1636_v40 = vadd.f32 %v1627_v38, %v1577_v21  ;;  %v1233_v41 = vpop.f32.mrb[3].mxu0 }
 0x12e   : > { %v1590_v42 = vpop.f32.mrb[20].mxu1  ;;  %v1274_v43 = vadd.f32 %v1635_v37, %v1493_v34  ;;  %v1637_v44 = vadd.f32 %v1233_v41, %v617_v22 }
 0x12f   : > { %v764_v45 = vadd.f32 %v1590_v42, %v650_v28  ;;  %v744_v46 = vpop.f32.mrb[21].mxu1  ;;  %v1283_v47 = vmax.f32 %v1276_v39, 0.0  ;;  %v1277_v48 = vadd.f32 %v1636_v40, %v1493_v34 }
 0x130   : > { %v762_v49 = vadd.f32 %v744_v46, %v648_v1  ;;  %v1591_v3 = vpop.f32.mrb[22].mxu1  ;;  %v1281_v50 = vmax.f32 %v1274_v43, 0.0  ;;  %v1275_v51 = vadd.f32 %v1637_v44, %v1493_v34 }
 0x131   : > { %v911_v52 = vadd.f32 %v1600_v59, %v764_v45  ;;  %v747_v53 = vpop.f32.mrb[23].mxu1  ;;  %1290 = vst [vmem:[%s2046_s6 + $0x10] sm:$0xff] %v1283_v47  ;;  %v1284_v54 = vmax.f32 %v1277_v48, 0.0 }
 0x132   : > { %v909_v55 = vadd.f32 %v2034_v60, %v762_v49  ;;  %v763_v56 = vadd.f32 %v747_v53, %v649_v32  ;;  %1288 = vst [vmem:[%s2046_s6] sm:$0xff] %v1281_v50  ;;  %v1282_v57 = vmax.f32 %v1275_v51, 0.0  ;;  %v1630_v61 = vpop.f32.mrb[16].mxu0 }
 0x133   : > { %v1006_v58 = vadd.f32 %v1610_v8, %v911_v52  ;;  %1291 = vst [vmem:[%s2046_s6 + $0x18] sm:$0xff] %v1284_v54  ;;  %v1246_v0 = vpop.f32.mrb[17].mxu0 }
 0x134   : > { %v910_v59 = vadd.f32 %v2036_v63, %v763_v56  ;;  %v1004_v62 = vadd.f32 %v986_v9, %v909_v55  ;;  %1289 = vst [vmem:[%s2046_s6 + $0x8] sm:$0xff] %v1282_v57  ;;  %v1631_v4 = vpop.f32.mrb[18].mxu0 }
 0x135   : > { %v1119_v2 = vadd.f32 %v1620_v23, %v1006_v58  ;;  %v1249_v6 = vpop.f32.mrb[19].mxu0 }
 0x136   : > { %v1117_v5 = vadd.f32 %v1099_v24, %v1004_v62  ;;  %v1005_v60 = vadd.f32 %v2038_v12, %v910_v59 }
 0x137   : > { %v1266_v7 = vadd.f32 %v1630_v61, %v1119_v2 }
 0x138   : > { %v1264_v8 = vadd.f32 %v1246_v0, %v1117_v5  ;;  %v1118_v10 = vadd.f32 %v1102_v27, %v1005_v60 }
 0x139   : > { %v1280_v11 = vadd.f32 %v1493_v34, %v1266_v7 }
 0x13a   : > { %v1278_v63 = vadd.f32 %v1493_v34, %v1264_v8  ;;  %v1265_v9 = vadd.f32 %v1249_v6, %v1118_v10 }
 0x13b   : > { %v1287_v13 = vmax.f32 %v1280_v11, 0.0 }
 0x13c   : > { %v1285_v14 = vmax.f32 %v1278_v63, 0.0  ;;  %v1279_v15 = vadd.f32 %v1493_v34, %v1265_v9 }
 0x13d   : > { %1294 = vst [vmem:[%s2046_s6 + $0x30] sm:$0xff] %v1287_v13 }
 0x13e   : > { %1292 = vst [vmem:[%s2046_s6 + $0x20] sm:$0xff] %v1285_v14  ;;  %v1286_v12 = vmax.f32 %v1279_v15, 0.0 }
 0x140   : > { %1293 = vst [vmem:[%s2046_s6 + $0x28] sm:$0xff] %v1286_v12 }
 0x141   : > { %1769 = shalt.err (!%p1766_p3)
}
 0x142   : > { %s1770_s25 = scalar_lea.hbm %s2061_s11, 896  ;;  %s1774_s28 = scalar_lea.hbm %s2113_s3, 1792 }
 0x143   : > { %p1771_p4 = scmp.ne.s32.totalorder %s2061_s11, %s1770_s25  ;;  %p1775_p9 = scmp.lt.u32.totalorder %s2061_s11, %s2113_s3 }
 0x144   : > { %p1776_p10 = scmp.lt.u32.totalorder %s1774_s28, %s1770_s25  ;;  %p1778_p12 = scmp.lt.u32.totalorder %s1770_s25, %s2061_s11 }
 0x145   : > { %p1772_p7 = pnand %p1771_p4, %p1881_p5 }
 0x146   : > { %p1777_p11 = por %p1776_p10, %p1775_p9 }
 0x147   : > { %p1773_p8 = pneg %p1772_p7 }
 0x148   : > { %p1779_p13 = por %p1778_p12, %p1777_p11 }
 0x14a   : > { %p1780_p0 = pnand %p1779_p13, %p1773_p8 }
 0x14c   : > { %1783 = shalt.err (!%p1780_p0)
}
 0x14d   : > { %s1821_s4 = smov 128   ;;  %s1822_s5 = smov 8  }
 0x14e   : > { %1679 = dma.vmem_to_hbm [thread:$0]  (%p1881_p5), %s2064_s8, 896, %s2061_s11, %s2069_s16, %s1821_s4, %s1821_s4, %s1822_s5  }
 0x14f PF: > { %p1685_p1 = scmp.ge.s32.totalorder %s1818_s15, 2  ;;  %s1324_s6 = sand.u32 1, %s1806_s12  }
 0x150   : > { %s1325_s7 = scalar_lea.sflag [#allocation3], %s1324_s6 }
 0x151   : > { %p1682_p2 = pnand %p1685_p1, %p1885_p6 }
 0x153   : > { %1801 = dma.done.wait (!%p1682_p2), %s1325_s7, 896  }
 0x154   : > { %1803 = vsyncadd (!%p1682_p2), %s1325_s7, 4294966400  ;;  %p13_p3 = scmp.ge.s32.totalorder %s1868_s18, 4   ;;  %s2116_s12 = smov %s1810_s13 }
 0x155   : > { %s2117_s13 = smov %s1814_s14  ;;  %s2118_s14 = smov %s1879_s21 }
 0x156   : > { %s2119_s15 = smov %s1868_s18  ;;  %15 = sbr.rel (!%p13_p3) target bundleno = 3 (0x3), region = 78 }
 0x15d   :  { %1330 = vsyncpa [#allocation3], 1 }
 0x15e   :  { %1332 = vsyncpa [#allocation3 + $0x1], 1 }

</bundles_post_ra>
